<compile_context>
chip_gen: v7x
topology: tpu7x:2x2x1
jax: 0.10.0
libtpu: 0.0.40
codegen_flags: <defaults>
</compile_context>

<pallas_src>
import functools

import jax
import jax.numpy as jnp
from jax.experimental import pallas as pl
from jax.experimental.pallas import tpu as pltpu

DROPOUT_P = 0.2
_KEEP_THRESHOLD = int(DROPOUT_P * (1 << 31))   # drop element if rand31 < threshold
_SEED_MIX = 0x61C88647                         # odd mixing constant < 2**31


def _round_up(x, m):
    return (x + m - 1) // m * m


def _srl(x, k):
    """Logical right shift for int32 (arithmetic shift + mask of sign-extended bits)."""
    return (x >> k) & jnp.int32((1 << (32 - k)) - 1)


def _hash32(x):
    """Wang-style int32 mixer; plenty of decorrelation for a dropout mask."""
    x = (x ^ jnp.int32(61)) ^ _srl(x, 16)
    x = x * jnp.int32(9)
    x = x ^ _srl(x, 4)
    x = x * jnp.int32(0x27D4EB2D)
    x = x ^ _srl(x, 15)
    return x


def mlp_kernel(seed_ref, x_ref, w1_ref, b1_ref, w2_ref, b2_ref,
               w3_ref, b3_ref, w4_ref, b4_ref, o_ref):
    tile = pl.program_id(0)

    x = x_ref[...].astype(jnp.bfloat16)

    # fc_s + relu  (bf16 MXU matmul, f32 accumulation)
    h = jnp.dot(x, w1_ref[...], preferred_element_type=jnp.float32) + b1_ref[...]
    h = jnp.maximum(h, 0.0)

    # fc2 + relu
    h = jnp.dot(h.astype(jnp.bfloat16), w2_ref[...],
                preferred_element_type=jnp.float32) + b2_ref[...]
    h = jnp.maximum(h, 0.0)

    # F.dropout(x, p=0.2) -- F.dropout defaults to training=True, so the module applies
    # inverted dropout unconditionally.  The 1/(1-p) scale is pre-folded into w3 by the
    # wrapper, so here we only zero dropped elements.  Mask = integer counter hash keyed
    # on (seed, global element index) -> unique mask per batch tile.
    tm, unit = h.shape
    rows = jax.lax.broadcasted_iota(jnp.int32, (tm, unit), 0)
    cols = jax.lax.broadcasted_iota(jnp.int32, (tm, unit), 1)
    gidx = (tile * tm + rows) * unit + cols
    bits = _hash32(gidx + seed_ref[0] * jnp.int32(_SEED_MIX))
    rand31 = bits & jnp.int32(0x7FFFFFFF)
    keep = rand31 >= jnp.int32(_KEEP_THRESHOLD)
    h = jnp.where(keep, h, 0.0)

    # fc3 + relu  (w3 pre-scaled by 1/(1-p))
    h = jnp.dot(h.astype(jnp.bfloat16), w3_ref[...],
                preferred_element_type=jnp.float32) + b3_ref[...]
    h = jnp.maximum(h, 0.0)

    # fc_e (no activation) -> lane-dense padded output slab
    o_ref[...] = (jnp.dot(h.astype(jnp.bfloat16), w4_ref[...],
                          preferred_element_type=jnp.float32)
                  + b4_ref[...]).astype(o_ref.dtype)


@functools.partial(jax.jit, static_argnames=("tm",))
def net_forward(x, params, seed, tm=256):
    b, in_size = x.shape
    unit = params["w1"].shape[1]
    out_size = params["w4"].shape[1]

    # Batch tile: big enough to feed the MXU at large batches, small enough that
    # x/out/intermediates + double-buffering stay far inside the v7x 64 MiB VMEM budget.
    tm = min(tm, _round_up(b, 8))
    b_pad = _round_up(b, tm)
    out_pad = _round_up(out_size, 128)   # lane-dense output

    x_pad = jnp.pad(x, ((0, b_pad - b), (0, 0))) if b_pad != b else x

    # bf16 weights for the MXU; fold the inverted-dropout scale into w3; pad fc_e to 128 lanes.
    w1 = params["w1"].astype(jnp.bfloat16)
    w2 = params["w2"].astype(jnp.bfloat16)
    w3 = (params["w3"] * (1.0 / (1.0 - DROPOUT_P))).astype(jnp.bfloat16)
    w4 = jnp.pad(params["w4"], ((0, 0), (0, out_pad - out_size))).astype(jnp.bfloat16)
    b4 = jnp.pad(params["b4"], ((0, 0), (0, out_pad - out_size)))

    grid = (b_pad // tm,)
    resident = lambda i, seed_ref: (0, 0)   # weights/biases stay VMEM-resident

    flops = 2 * b_pad * (in_size * unit + 2 * unit * unit + unit * out_pad)
    bytes_accessed = (4 * b_pad * (in_size + out_pad)                       # x + out (f32)
                      + 2 * (in_size * unit + 2 * unit * unit + unit * out_pad)  # bf16 weights
                      + 4 * (3 * unit + out_pad))                           # f32 biases

    out = pl.pallas_call(
        mlp_kernel,
        out_shape=jax.ShapeDtypeStruct((b_pad, out_pad), jnp.float32),
        grid_spec=pltpu.PrefetchScalarGridSpec(
            num_scalar_prefetch=1,          # seed lives in SMEM, no per-step DMA
            grid=grid,
            in_specs=[
                pl.BlockSpec((tm, in_size), lambda i, seed_ref: (i, 0)),   # x tile
                pl.BlockSpec((in_size, unit), resident),                   # w1
                pl.BlockSpec((1, unit), resident),                         # b1
                pl.BlockSpec((unit, unit), resident),                      # w2
                pl.BlockSpec((1, unit), resident),                         # b2
                pl.BlockSpec((unit, unit), resident),                      # w3 (pre-scaled)
                pl.BlockSpec((1, unit), resident),                         # b3
                pl.BlockSpec((unit, out_pad), resident),                   # w4 (padded)
                pl.BlockSpec((1, out_pad), resident),                      # b4 (padded)
            ],
            out_specs=pl.BlockSpec((tm, out_pad), lambda i, seed_ref: (i, 0)),
        ),
        compiler_params=pltpu.CompilerParams(
            dimension_semantics=("parallel",),   # v7x: shard batch tiles over both TCs
        ),
        cost_estimate=pl.CostEstimate(flops=flops, transcendentals=0,
                                      bytes_accessed=bytes_accessed),
    )(seed, x_pad,
      w1, params["b1"], w2, params["b2"], w3, params["b3"], w4, b4)

    return out[:b, :out_size]


def init_linear(key, fan_in, fan_out):
    # PyTorch nn.Linear default init: U(-1/sqrt(fan_in), 1/sqrt(fan_in))
    kw, kb = jax.random.split(key)
    bound = 1.0 / jnp.sqrt(float(fan_in))
    w = jax.random.uniform(kw, (fan_in, fan_out), jnp.float32, -bound, bound)
    b = jax.random.uniform(kb, (1, fan_out), jnp.float32, -bound, bound)
    return w, b


def init_params(key, input_size, output_size, unit_size):
    k1, k2, k3, k4 = jax.random.split(key, 4)
    w1, b1 = init_linear(k1, input_size, unit_size)   # fc_s
    w2, b2 = init_linear(k2, unit_size, unit_size)    # fc2
    w3, b3 = init_linear(k3, unit_size, unit_size)    # fc3
    w4, b4 = init_linear(k4, unit_size, output_size)  # fc_e
    return dict(w1=w1, b1=b1, w2=w2, b2=b2, w3=w3, b3=b3, w4=w4, b4=b4)


if __name__ == "__main__":
    INPUT_SIZE = 32
    UNIT_SIZE = 128
    OUTPUT_SIZE = 16
    BATCH = 8

    key = jax.random.PRNGKey(0)
    kp, kx = jax.random.split(key)

    params = init_params(kp, INPUT_SIZE, OUTPUT_SIZE, UNIT_SIZE)
    x = jax.random.normal(kx, (BATCH, INPUT_SIZE), dtype=jnp.float32)
    seed = jnp.array([1234], dtype=jnp.int32)

    out = net_forward(x, params, seed)
    jax.block_until_ready(out)

    assert out.shape == (BATCH, OUTPUT_SIZE)
    assert out.dtype == jnp.float32
    assert bool(jnp.all(jnp.isfinite(out)))
    print("KERNEL_OK")
</pallas_src>

<mosaic_0001>
module attributes {stable_mosaic.version = 11 : i64} {
  func.func @mlp_kernel(%arg0: i32, %arg1: memref<1xi32, #tpu.memory_space<smem>>, %arg2: memref<8x32xf32, #tpu.memory_space<vmem>>, %arg3: memref<32x128xbf16, #tpu.memory_space<vmem>>, %arg4: memref<1x128xf32, #tpu.memory_space<vmem>>, %arg5: memref<128x128xbf16, #tpu.memory_space<vmem>>, %arg6: memref<1x128xf32, #tpu.memory_space<vmem>>, %arg7: memref<128x128xbf16, #tpu.memory_space<vmem>>, %arg8: memref<1x128xf32, #tpu.memory_space<vmem>>, %arg9: memref<128x128xbf16, #tpu.memory_space<vmem>>, %arg10: memref<1x128xf32, #tpu.memory_space<vmem>>, %arg11: memref<8x128xf32, #tpu.memory_space<vmem>>) attributes {dimension_semantics = [#tpu.dimension_semantics<parallel>], iteration_bounds = array<i64: 1>, scalar_prefetch = 1 : i64, scratch_operands = 0 : i64, tpu.core_type = #tpu.core_type<tc>, window_params = [{transform_indices = @transform_0, window_bounds = array<i64: 8, 32>}, {pipeline_mode = #tpu.pipeline_mode<synchronous>, transform_indices = @transform_1, window_bounds = array<i64: 32, 128>}, {pipeline_mode = #tpu.pipeline_mode<synchronous>, transform_indices = @transform_2, window_bounds = array<i64: 1, 128>}, {pipeline_mode = #tpu.pipeline_mode<synchronous>, transform_indices = @transform_3, window_bounds = array<i64: 128, 128>}, {pipeline_mode = #tpu.pipeline_mode<synchronous>, transform_indices = @transform_4, window_bounds = array<i64: 1, 128>}, {pipeline_mode = #tpu.pipeline_mode<synchronous>, transform_indices = @transform_5, window_bounds = array<i64: 128, 128>}, {pipeline_mode = #tpu.pipeline_mode<synchronous>, transform_indices = @transform_6, window_bounds = array<i64: 1, 128>}, {pipeline_mode = #tpu.pipeline_mode<synchronous>, transform_indices = @transform_7, window_bounds = array<i64: 128, 128>}, {pipeline_mode = #tpu.pipeline_mode<synchronous>, transform_indices = @transform_8, window_bounds = array<i64: 1, 128>}, {transform_indices = @transform_9, window_bounds = array<i64: 8, 128>}]} {
    %c0 = arith.constant 0 : index
    %c0_0 = arith.constant 0 : index
    %0 = vector.load %arg2[%c0, %c0_0] : memref<8x32xf32, #tpu.memory_space<vmem>>, vector<8x32xf32>
    %1 = arith.truncf %0 : vector<8x32xf32> to vector<8x32xbf16>
    %c0_1 = arith.constant 0 : index
    %c0_2 = arith.constant 0 : index
    %2 = vector.load %arg3[%c0_1, %c0_2] : memref<32x128xbf16, #tpu.memory_space<vmem>>, vector<32x128xbf16>
    %cst = arith.constant dense<0.000000e+00> : vector<8x128xf32>
    %3 = tpu.matmul %1, %2, %cst {dimension_numbers = #tpu.dot_dimension_numbers<[1], [0], [0], [1], [0, 0, 1, 1], [], []>} : vector<8x32xbf16>, vector<32x128xbf16>, vector<8x128xf32> -> vector<8x128xf32>
    %c0_3 = arith.constant 0 : index
    %c0_4 = arith.constant 0 : index
    %4 = vector.load %arg4[%c0_3, %c0_4] : memref<1x128xf32, #tpu.memory_space<vmem>>, vector<1x128xf32>
    %5 = vector.broadcast %4 : vector<1x128xf32> to vector<8x128xf32>
    %6 = arith.addf %3, %5 : vector<8x128xf32>
    %cst_5 = arith.constant 0.000000e+00 : f32
    %7 = vector.broadcast %cst_5 : f32 to vector<8x128xf32>
    %8 = arith.maximumf %6, %7 : vector<8x128xf32>
    %9 = arith.truncf %8 : vector<8x128xf32> to vector<8x128xbf16>
    %c0_6 = arith.constant 0 : index
    %c0_7 = arith.constant 0 : index
    %10 = vector.load %arg5[%c0_6, %c0_7] : memref<128x128xbf16, #tpu.memory_space<vmem>>, vector<128x128xbf16>
    %cst_8 = arith.constant dense<0.000000e+00> : vector<8x128xf32>
    %11 = tpu.matmul %9, %10, %cst_8 {dimension_numbers = #tpu.dot_dimension_numbers<[1], [0], [0], [1], [0, 0, 1, 1], [], []>} : vector<8x128xbf16>, vector<128x128xbf16>, vector<8x128xf32> -> vector<8x128xf32>
    %c0_9 = arith.constant 0 : index
    %c0_10 = arith.constant 0 : index
    %12 = vector.load %arg6[%c0_9, %c0_10] : memref<1x128xf32, #tpu.memory_space<vmem>>, vector<1x128xf32>
    %13 = vector.broadcast %12 : vector<1x128xf32> to vector<8x128xf32>
    %14 = arith.addf %11, %13 : vector<8x128xf32>
    %cst_11 = arith.constant 0.000000e+00 : f32
    %15 = vector.broadcast %cst_11 : f32 to vector<8x128xf32>
    %16 = arith.maximumf %14, %15 : vector<8x128xf32>
    %17 = tpu.iota {dimensions = array<i32: 0>} : vector<8x128xi32>
    %18 = tpu.iota {dimensions = array<i32: 1>} : vector<8x128xi32>
    %c8_i32 = arith.constant 8 : i32
    %19 = arith.muli %arg0, %c8_i32 : i32
    %20 = vector.broadcast %19 : i32 to vector<8x128xi32>
    %21 = arith.addi %20, %17 : vector<8x128xi32>
    %c128_i32 = arith.constant 128 : i32
    %22 = vector.broadcast %c128_i32 : i32 to vector<8x128xi32>
    %23 = arith.muli %21, %22 : vector<8x128xi32>
    %24 = arith.addi %23, %18 : vector<8x128xi32>
    %c0_12 = arith.constant 0 : index
    %25 = memref.load %arg1[%c0_12] : memref<1xi32, #tpu.memory_space<smem>>
    %c1640531527_i32 = arith.constant 1640531527 : i32
    %26 = arith.muli %25, %c1640531527_i32 : i32
    %27 = vector.broadcast %26 : i32 to vector<8x128xi32>
    %28 = arith.addi %24, %27 : vector<8x128xi32>
    %c61_i32 = arith.constant 61 : i32
    %29 = vector.broadcast %c61_i32 : i32 to vector<8x128xi32>
    %30 = arith.xori %28, %29 : vector<8x128xi32>
    %c16_i32 = arith.constant 16 : i32
    %31 = vector.broadcast %c16_i32 : i32 to vector<8x128xi32>
    %32 = arith.shrsi %28, %31 : vector<8x128xi32>
    %c65535_i32 = arith.constant 65535 : i32
    %33 = vector.broadcast %c65535_i32 : i32 to vector<8x128xi32>
    %34 = arith.andi %32, %33 : vector<8x128xi32>
    %35 = arith.xori %30, %34 : vector<8x128xi32>
    %c9_i32 = arith.constant 9 : i32
    %36 = vector.broadcast %c9_i32 : i32 to vector<8x128xi32>
    %37 = arith.muli %35, %36 : vector<8x128xi32>
    %c4_i32 = arith.constant 4 : i32
    %38 = vector.broadcast %c4_i32 : i32 to vector<8x128xi32>
    %39 = arith.shrsi %37, %38 : vector<8x128xi32>
    %c268435455_i32 = arith.constant 268435455 : i32
    %40 = vector.broadcast %c268435455_i32 : i32 to vector<8x128xi32>
    %41 = arith.andi %39, %40 : vector<8x128xi32>
    %42 = arith.xori %37, %41 : vector<8x128xi32>
    %c668265261_i32 = arith.constant 668265261 : i32
    %43 = vector.broadcast %c668265261_i32 : i32 to vector<8x128xi32>
    %44 = arith.muli %42, %43 : vector<8x128xi32>
    %c15_i32 = arith.constant 15 : i32
    %45 = vector.broadcast %c15_i32 : i32 to vector<8x128xi32>
    %46 = arith.shrsi %44, %45 : vector<8x128xi32>
    %c131071_i32 = arith.constant 131071 : i32
    %47 = vector.broadcast %c131071_i32 : i32 to vector<8x128xi32>
    %48 = arith.andi %46, %47 : vector<8x128xi32>
    %49 = arith.xori %44, %48 : vector<8x128xi32>
    %c2147483647_i32 = arith.constant 2147483647 : i32
    %50 = vector.broadcast %c2147483647_i32 : i32 to vector<8x128xi32>
    %51 = arith.andi %49, %50 : vector<8x128xi32>
    %c429496729_i32 = arith.constant 429496729 : i32
    %52 = vector.broadcast %c429496729_i32 : i32 to vector<8x128xi32>
    %53 = arith.cmpi sge, %51, %52 : vector<8x128xi32>
    %cst_13 = arith.constant 0.000000e+00 : f32
    %54 = vector.broadcast %cst_13 : f32 to vector<8x128xf32>
    %55 = arith.select %53, %16, %54 : vector<8x128xi1>, vector<8x128xf32>
    %56 = arith.truncf %55 : vector<8x128xf32> to vector<8x128xbf16>
    %c0_14 = arith.constant 0 : index
    %c0_15 = arith.constant 0 : index
    %57 = vector.load %arg7[%c0_14, %c0_15] : memref<128x128xbf16, #tpu.memory_space<vmem>>, vector<128x128xbf16>
    %cst_16 = arith.constant dense<0.000000e+00> : vector<8x128xf32>
    %58 = tpu.matmul %56, %57, %cst_16 {dimension_numbers = #tpu.dot_dimension_numbers<[1], [0], [0], [1], [0, 0, 1, 1], [], []>} : vector<8x128xbf16>, vector<128x128xbf16>, vector<8x128xf32> -> vector<8x128xf32>
    %c0_17 = arith.constant 0 : index
    %c0_18 = arith.constant 0 : index
    %59 = vector.load %arg8[%c0_17, %c0_18] : memref<1x128xf32, #tpu.memory_space<vmem>>, vector<1x128xf32>
    %60 = vector.broadcast %59 : vector<1x128xf32> to vector<8x128xf32>
    %61 = arith.addf %58, %60 : vector<8x128xf32>
    %cst_19 = arith.constant 0.000000e+00 : f32
    %62 = vector.broadcast %cst_19 : f32 to vector<8x128xf32>
    %63 = arith.maximumf %61, %62 : vector<8x128xf32>
    %64 = arith.truncf %63 : vector<8x128xf32> to vector<8x128xbf16>
    %c0_20 = arith.constant 0 : index
    %c0_21 = arith.constant 0 : index
    %65 = vector.load %arg9[%c0_20, %c0_21] : memref<128x128xbf16, #tpu.memory_space<vmem>>, vector<128x128xbf16>
    %cst_22 = arith.constant dense<0.000000e+00> : vector<8x128xf32>
    %66 = tpu.matmul %64, %65, %cst_22 {dimension_numbers = #tpu.dot_dimension_numbers<[1], [0], [0], [1], [0, 0, 1, 1], [], []>} : vector<8x128xbf16>, vector<128x128xbf16>, vector<8x128xf32> -> vector<8x128xf32>
    %c0_23 = arith.constant 0 : index
    %c0_24 = arith.constant 0 : index
    %67 = vector.load %arg10[%c0_23, %c0_24] : memref<1x128xf32, #tpu.memory_space<vmem>>, vector<1x128xf32>
    %68 = vector.broadcast %67 : vector<1x128xf32> to vector<8x128xf32>
    %69 = arith.addf %66, %68 : vector<8x128xf32>
    %c0_25 = arith.constant 0 : index
    %c0_26 = arith.constant 0 : index
    %70 = vector.load %arg11[%c0_25, %c0_26] : memref<8x128xf32, #tpu.memory_space<vmem>>, vector<8x128xf32>
    tpu.vector_store %arg11[%c0_25, %c0_26], %69 {strides = array<i32>} : memref<8x128xf32, #tpu.memory_space<vmem>>, vector<8x128xf32>,
    return
  }
  func.func @transform_0(%arg0: i32, %arg1: memref<1xi32, #tpu.memory_space<smem>>) -> (i32, i32) {
    %c0_i32 = arith.constant 0 : i32
    %c0_i32_0 = arith.constant 0 : i32
    return %arg0, %c0_i32 : i32, i32
  }
  func.func @transform_1(%arg0: i32, %arg1: memref<1xi32, #tpu.memory_space<smem>>) -> (i32, i32) {
    %c0_i32 = arith.constant 0 : i32
    %c0_i32_0 = arith.constant 0 : i32
    %c0_i32_1 = arith.constant 0 : i32
    return %c0_i32, %c0_i32_0 : i32, i32
  }
  func.func @transform_2(%arg0: i32, %arg1: memref<1xi32, #tpu.memory_space<smem>>) -> (i32, i32) {
    %c0_i32 = arith.constant 0 : i32
    %c0_i32_0 = arith.constant 0 : i32
    %c0_i32_1 = arith.constant 0 : i32
    return %c0_i32, %c0_i32_0 : i32, i32
  }
  func.func @transform_3(%arg0: i32, %arg1: memref<1xi32, #tpu.memory_space<smem>>) -> (i32, i32) {
    %c0_i32 = arith.constant 0 : i32
    %c0_i32_0 = arith.constant 0 : i32
    %c0_i32_1 = arith.constant 0 : i32
    return %c0_i32, %c0_i32_0 : i32, i32
  }
  func.func @transform_4(%arg0: i32, %arg1: memref<1xi32, #tpu.memory_space<smem>>) -> (i32, i32) {
    %c0_i32 = arith.constant 0 : i32
    %c0_i32_0 = arith.constant 0 : i32
    %c0_i32_1 = arith.constant 0 : i32
    return %c0_i32, %c0_i32_0 : i32, i32
  }
  func.func @transform_5(%arg0: i32, %arg1: memref<1xi32, #tpu.memory_space<smem>>) -> (i32, i32) {
    %c0_i32 = arith.constant 0 : i32
    %c0_i32_0 = arith.constant 0 : i32
    %c0_i32_1 = arith.constant 0 : i32
    return %c0_i32, %c0_i32_0 : i32, i32
  }
  func.func @transform_6(%arg0: i32, %arg1: memref<1xi32, #tpu.memory_space<smem>>) -> (i32, i32) {
    %c0_i32 = arith.constant 0 : i32
    %c0_i32_0 = arith.constant 0 : i32
    %c0_i32_1 = arith.constant 0 : i32
    return %c0_i32, %c0_i32_0 : i32, i32
  }
  func.func @transform_7(%arg0: i32, %arg1: memref<1xi32, #tpu.memory_space<smem>>) -> (i32, i32) {
    %c0_i32 = arith.constant 0 : i32
    %c0_i32_0 = arith.constant 0 : i32
    %c0_i32_1 = arith.constant 0 : i32
    return %c0_i32, %c0_i32_0 : i32, i32
  }
  func.func @transform_8(%arg0: i32, %arg1: memref<1xi32, #tpu.memory_space<smem>>) -> (i32, i32) {
    %c0_i32 = arith.constant 0 : i32
    %c0_i32_0 = arith.constant 0 : i32
    %c0_i32_1 = arith.constant 0 : i32
    return %c0_i32, %c0_i32_0 : i32, i32
  }
  func.func @transform_9(%arg0: i32, %arg1: memref<1xi32, #tpu.memory_space<smem>>) -> (i32, i32) {
    %c0_i32 = arith.constant 0 : i32
    %c0_i32_0 = arith.constant 0 : i32
    return %arg0, %c0_i32 : i32, i32
  }
}

</mosaic_0001>

<bundles_post_ra>
// kernel: net_forward.1
= control target key start
LH: loop header
LB: loop body
LE: loop exit
PB: predicated region body
PF: predicated region fallthrough
CT: control target
= control target key end

     0   :  { %v675_v1 = vmov 0.0   ;;  %vm676_vm0 = vmmov 0   ;;  %vm61_vm1 = vcmask 261120   ;;  %s875_s0 = inlined_call_operand.<no memory space> [shape: s32[1], index: 0, kind: input, shape index: {}]   ;;  %s876_s1 = inlined_call_operand.vmem [shape: f32[8,32], index: 1, kind: input, shape index: {}]   ;;  %s877_s2 = inlined_call_operand.vmem [shape: bf16[32,128], index: 2, kind: input, shape index: {}]   ;;  %s878_s3 = inlined_call_operand.vmem [shape: f32[1,128], index: 3, kind: input, shape index: {}]   ;;  %s879_s4 = inlined_call_operand.vmem [shape: bf16[128,128], index: 4, kind: input, shape index: {}]   ;;  %s880_s5 = inlined_call_operand.vmem [shape: f32[1,128], index: 5, kind: input, shape index: {}]   ;;  %s881_s6 = inlined_call_operand.vmem [shape: bf16[128,128], index: 6, kind: input, shape index: {}]   ;;  %s882_s7 = inlined_call_operand.vmem [shape: f32[1,128], index: 7, kind: input, shape index: {}]   ;;  %s883_s8 = inlined_call_operand.vmem [shape: bf16[128,128], index: 8, kind: input, shape index: {}]   ;;  %s884_s9 = inlined_call_operand.vmem [shape: f32[1,128], index: 9, kind: input, shape index: {}]   ;;  %s885_s10 = inlined_call_operand.hbm [shape: f32[8,128], index: 10, kind: output, shape index: {}]  }
   0x1   :  { %v625_v0 = vld [vmem:[%s877_s2] sm:$0xff]   ;;  %554 = vmatprep.subr.bf16.mxu0 %v675_v1  ;;  %v626_v2 = vld [vmem:[%s877_s2 + $0x8] sm:$0xff]   ;;  %562 = vmatprep.subr.bf16.mxu1 %v675_v1  ;;  %v629_v7 = vld [vmem:[%s879_s4 + $0x10] sm:$0xff]  }
   0x2   :  { %555 = vmatpush3.bf16.msra.mxu0 %v625_v0  ;;  %558 = vmatprep.mubr.msk.bf16.mxu0 %vm676_vm0, %v675_v1  ;;  %v36_v3 = vld [vmem:[%s876_s1] sm:$0xff]  ;;  %v628_v6 = vld [vmem:[%s879_s4 + $0x8] sm:$0xff]   ;;  %v630_v8 = vld [vmem:[%s879_s4 + $0x18] sm:$0xff]  }
   0x3   :  { %556 = vmatprep.subr.bf16.mxu0 %v675_v1  ;;  %v627_v4 = vld [vmem:[%s879_s4] sm:$0xff]   ;;  %578 = vmatprep.mubr.msk.bf16.mxu1 %vm676_vm0, %v675_v1  ;;  %v37_v5 = vpack.c.bf16 %v36_v3, %v36_v3 }
   0x4   :  { %563 = vmatpush3.bf16.msra.mxu1 %v627_v4  ;;  %v631_v9 = vld [vmem:[%s879_s4 + $0x20] sm:$0xff]  }
   0x5   :  { %564 = vmatprep.subr.bf16.mxu1 %v675_v1 }
   0x6   :  { %557 = vmatpush3.bf16.msra.mxu0 %v626_v2 }
   0x7   :  { %582 = vmatprep.subr.bf16.mxu0 %v675_v1 }
   0x8   :  { %565 = vmatpush3.bf16.msra.mxu1 %v628_v6 }
   0x9   :  { %559 = vmatmul.mubr.msk.bf16.vlgmr.msra.gmra.mrb[0].mxu0 %vm61_vm1, %v37_v5  ;;  %566 = vmatprep.subr.bf16.mxu1 %v675_v1 }
   0xa   :  { %598 = vmatprep.mubr.msk.bf16.mxu0 %vm676_vm0, %v675_v1 }
   0xc   :  { %567 = vmatpush3.bf16.msra.mxu1 %v629_v7 }
   0xd   :  { %568 = vmatprep.subr.bf16.mxu1 %v675_v1 }
  0x10   :  { %569 = vmatpush3.bf16.msra.mxu1 %v630_v8 }
  0x11   :  { %570 = vmatprep.subr.bf16.mxu1 %v675_v1 }
  0x12   :  { %16 = vsyncpa [#allocation5], 0  ;;  %v632_v10 = vld [vmem:[%s879_s4 + $0x28] sm:$0xff]   ;;  %v633_v11 = vld [vmem:[%s879_s4 + $0x30] sm:$0xff]   ;;  %v219_v35 = vlaneseq  ;;  %s229_s19 = smul.u32 1640531527, %s875_s0 }
  0x13   :  { %v634_v12 = vld [vmem:[%s879_s4 + $0x38] sm:$0xff]   ;;  %v635_v13 = vld [vmem:[%s881_s6] sm:$0xff]   ;;  %v636_v14 = vld [vmem:[%s881_s6 + $0x8] sm:$0xff]   ;;  %s677_s26 = smov [#allocation4]  }
  0x14   :  { %571 = vmatpush3.bf16.msra.mxu1 %v631_v9  ;;  %583 = vmatpush3.bf16.msra.mxu0 %v635_v13  ;;  %v637_v15 = vld [vmem:[%s881_s6 + $0x10] sm:$0xff]   ;;  %v638_v16 = vld [vmem:[%s881_s6 + $0x18] sm:$0xff]   ;;  %v639_v17 = vld [vmem:[%s881_s6 + $0x20] sm:$0xff]   ;;  %v220_v36 = vshrl.u32 %v219_v35, 7  ;;  %v222_v37 = vand.u32 127, %v219_v35  ;;  %v230_v40 = vstv %s229_s19 }
  0x15   :  { %572 = vmatprep.subr.bf16.mxu1 %v675_v1  ;;  %584 = vmatprep.subr.bf16.mxu0 %v675_v1  ;;  %v640_v18 = vld [vmem:[%s881_s6 + $0x28] sm:$0xff]   ;;  %v487_v19 = vld [vmem:[%s878_s3] ss:$0 sm:$0xff]  ;;  %v641_v27 = vld [vmem:[%s881_s6 + $0x30] sm:$0xff]   ;;  %s479_s3 = sshll.u32 %s677_s26, 4  ;;  %s480_s3 = int_to_ptr.vmem [resolvable:$true] %s479_s3 }
  0x16   :  { %v642_v28 = vld [vmem:[%s881_s6 + $0x38] sm:$0xff]   ;;  %v643_v29 = vld [vmem:[%s883_s8] sm:$0xff]   ;;  %v644_v30 = vld [vmem:[%s883_s8 + $0x8] sm:$0xff]   ;;  %v226_v38 = vmul.u32 128, %v220_v36  ;;  %p656_p1 = scmp.lt.s32.totalorder %s480_s3, %s480_s3 }
  0x17   :  { %v645_v31 = vld [vmem:[%s883_s8 + $0x10] sm:$0xff]   ;;  %v646_v32 = vld [vmem:[%s883_s8 + $0x18] sm:$0xff]   ;;  %v647_v33 = vld [vmem:[%s883_s8 + $0x20] sm:$0xff]  }
  0x18   :  { %573 = vmatpush3.bf16.msra.mxu1 %v632_v10  ;;  %585 = vmatpush3.bf16.msra.mxu0 %v636_v14  ;;  %v648_v34 = vld [vmem:[%s883_s8 + $0x28] sm:$0xff]   ;;  %v227_v39 = vadd.s32 %v226_v38, %v222_v37  ;;  %v491_v52 = vld [vmem:[%s880_s5] ss:$0 sm:$0xff]  ;;  %v649_v60 = vld [vmem:[%s883_s8 + $0x30] sm:$0xff]  }
  0x19   :  { %574 = vmatprep.subr.bf16.mxu1 %v675_v1  ;;  %586 = vmatprep.subr.bf16.mxu0 %v675_v1  ;;  %v650_v61 = vld [vmem:[%s883_s8 + $0x38] sm:$0xff]   ;;  %v503_v62 = vld [vmem:[%s882_s7] ss:$0 sm:$0xff]  ;;  %s651_s7 = scalar_lea.vmem %s480_s3, 128 }
  0x1a   :  { %v231_v41 = vadd.s32 %v230_v40, %v227_v39  ;;  %p652_p0 = scmp.ne.s32.totalorder %s480_s3, %s651_s7  ;;  %p657_p2 = scmp.lt.s32.totalorder %s651_s7, %s651_s7 }
  0x1c   :  { %575 = vmatpush3.bf16.msra.mxu1 %v633_v11  ;;  %587 = vmatpush3.bf16.msra.mxu0 %v637_v15  ;;  %v232_v42 = vxor.u32 61, %v231_v41  ;;  %v500_v43 = vshrl.u32 %v231_v41, 16  ;;  %p658_p3 = por %p657_p2, %p656_p1 }
  0x1d   :  { %576 = vmatprep.subr.bf16.mxu1 %v675_v1  ;;  %588 = vmatprep.subr.bf16.mxu0 %v675_v1 }
  0x1e   :  { %v235_v44 = vxor.u32 %v500_v43, %v232_v42  ;;  %p659_p4 = pnand %p658_p3, %p652_p0 }
  0x20   :  { %577 = vmatpush3.bf16.msra.mxu1 %v634_v12  ;;  %589 = vmatpush3.bf16.msra.mxu0 %v638_v16  ;;  %v236_v45 = vmul.u32 9, %v235_v44 }
  0x21   :  { %602 = vmatprep.subr.bf16.mxu1 %v675_v1  ;;  %590 = vmatprep.subr.bf16.mxu0 %v675_v1 }
  0x22   :  { %v501_v46 = vshrl.u32 %v236_v45, 4 }
  0x24   :  { %591 = vmatpush3.bf16.msra.mxu0 %v639_v17  ;;  %v239_v47 = vxor.u32 %v501_v46, %v236_v45 }
  0x25   :  { %592 = vmatprep.subr.bf16.mxu0 %v675_v1 }
  0x26   :  { %v240_v48 = vmul.u32 668265261, %v239_v47 }
  0x28   :  { %593 = vmatpush3.bf16.msra.mxu0 %v640_v18  ;;  %v502_v49 = vshrl.u32 %v240_v48, 15 }
  0x29   :  { %594 = vmatprep.subr.bf16.mxu0 %v675_v1 }
  0x2a   :  { %v243_v50 = vxor.u32 %v502_v49, %v240_v48 }
  0x2c   :  { %595 = vmatpush3.bf16.msra.mxu0 %v641_v27  ;;  %v244_v51 = vand.u32 2147483647, %v243_v50 }
  0x2d   :  { %596 = vmatprep.subr.bf16.mxu0 %v675_v1 }
  0x2e   :  { %vm245_vm2 = vcmp.ge.s32.totalorder %v244_v51, 429496729 }
  0x2f   :  { %vm512_vm3 = vmpackc.low %vm245_vm2, %vm245_vm2 }
  0x30   :  { %597 = vmatpush3.bf16.msra.mxu0 %v642_v28 }
  0xdc   :  { %v99_v20 = vpop.f32.mrb[0].mxu0 }
  0xdd   :  { %v100_v21 = vadd.f32 %v487_v19, %v99_v20  ;;  %v560_v22 = vpop.f32.mrb[1].mxu0 }
  0xde   :  { %v102_v23 = vpop.f32.mrb[2].mxu0 }
  0xdf   :  { %v105_v24 = vmax.f32 %v100_v21, 0.0  ;;  %v561_v25 = vpop.f32.mrb[3].mxu0 }
  0xe1   :  { %v106_v26 = vpack.c.bf16 %v105_v24, %v105_v24 }
  0xe3   :  { %579 = vmatmul.mubr.bf16.vlgmr.msra.gmra.mrb[0].mxu1 %v106_v26 }
  0xe4   :  { %618 = vmatprep.mubr.msk.bf16.mxu1 %vm676_vm0, %v675_v1  ;;  %603 = vmatpush3.bf16.msra.mxu1 %v643_v29 }
  0xe5   :  { %604 = vmatprep.subr.bf16.mxu1 %v675_v1 }
  0xe8   :  { %605 = vmatpush3.bf16.msra.mxu1 %v644_v30 }
  0xe9   :  { %606 = vmatprep.subr.bf16.mxu1 %v675_v1 }
  0xec   :  { %607 = vmatpush3.bf16.msra.mxu1 %v645_v31 }
  0xed   :  { %608 = vmatprep.subr.bf16.mxu1 %v675_v1 }
  0xf0   :  { %609 = vmatpush3.bf16.msra.mxu1 %v646_v32 }
  0xf1   :  { %610 = vmatprep.subr.bf16.mxu1 %v675_v1 }
  0xf4   :  { %611 = vmatpush3.bf16.msra.mxu1 %v647_v33 }
  0xf5   :  { %612 = vmatprep.subr.bf16.mxu1 %v675_v1 }
  0xf8   :  { %613 = vmatpush3.bf16.msra.mxu1 %v648_v34 }
  0xf9   :  { %614 = vmatprep.subr.bf16.mxu1 %v675_v1 }
  0xfc   :  { %615 = vmatpush3.bf16.msra.mxu1 %v649_v60 }
  0xfd   :  { %616 = vmatprep.subr.bf16.mxu1 %v675_v1  ;;  %v515_v1 = vld [vmem:[%s884_s9] ss:$0 sm:$0xff] }
 0x100   :  { %617 = vmatpush3.bf16.msra.mxu1 %v650_v61 }
 0x1b6   :  { %v212_v53 = vpop.f32.mrb[0].mxu1 }
 0x1b7   :  { %v213_v54 = vadd.f32 %v491_v52, %v212_v53  ;;  %v580_v55 = vpop.f32.mrb[1].mxu1 }
 0x1b8   :  { %v215_v56 = vpop.f32.mrb[2].mxu1 }
 0x1b9   :  { %v218_v57 = vmax.f32 %v213_v54, 0.0  ;;  %v581_v58 = vpop.f32.mrb[3].mxu1 }
 0x1bb   :  { %v513_v59 = vpack.c.bf16 %v218_v57, %v218_v57 }
 0x1bd   :  { %599 = vmatmul.mubr.msk.bf16.vlgmr.msra.gmra.mrb[4].mxu0 %vm512_vm3, %v513_v59 }
 0x290   :  { %v353_v63 = vpop.f32.mrb[4].mxu0 }
 0x291   :  { %v354_v0 = vadd.f32 %v503_v62, %v353_v63  ;;  %v600_v2 = vpop.f32.mrb[5].mxu0 }
 0x292   :  { %v356_v3 = vpop.f32.mrb[6].mxu0 }
 0x293   :  { %v359_v4 = vmax.f32 %v354_v0, 0.0  ;;  %v601_v5 = vpop.f32.mrb[7].mxu0 }
 0x295   :  { %v360_v6 = vpack.c.bf16 %v359_v4, %v359_v4 }
 0x297   :  { %619 = vmatmul.mubr.bf16.vlgmr.msra.gmra.mrb[4].mxu1 %v360_v6 }
 0x36a   :  { %v466_v7 = vpop.f32.mrb[4].mxu1 }
 0x36b   :  { %v467_v8 = vadd.f32 %v515_v1, %v466_v7  ;;  %v620_v9 = vpop.f32.mrb[5].mxu1 }
 0x36c   :  { %v469_v10 = vpop.f32.mrb[6].mxu1 }
 0x36d   :  { %472 = vst [vmem:[#allocation4] sm:$0xff] %v467_v8  ;;  %v621_v11 = vpop.f32.mrb[7].mxu1 }
 0x36e   :  { %662 = shalt.err (!%p659_p4)
}
 0x36f   :  { %s663_s9 = scalar_lea.hbm %s885_s10, 128 }
 0x370   :  { %p664_p5 = scmp.ne.s32.totalorder %s885_s10, %s663_s9  ;;  %p667_p6 = scmp.lt.u32.totalorder %s663_s9, %s885_s10 }
 0x372   :  { %p669_p7 = pnand %p667_p6, %p664_p5 }
 0x374   :  { %672 = shalt.err (!%p669_p7)
}
 0x375   :  { %482 = dma.vmem_to_hbm [thread:$0]  %s480_s3, 128, %s885_s10, [#allocation5]  }
 0x376   :  { %673 = dma.done.wait [#allocation5], 128  }
 0x377   :  { %674 = vsyncadd [#allocation5], 4294967168 }
 0x378   :  { %486 = vsyncpa [#allocation5], 1 }

</bundles_post_ra>
